<compile_context>
chip_gen: v5e
topology: v5e:2x2
jax: 0.10.0
libtpu: 0.0.40
codegen_flags: <defaults>
</compile_context>

<pallas_src>
import functools
from dataclasses import dataclass

import jax
import jax.numpy as jnp
from jax.experimental import pallas as pl
from jax.experimental.pallas import tpu as pltpu


@dataclass
class QFNNConfig:
    dt_scale: float = 0.1
    beta: float = 1.0
    epsilon: float = 1e-6


def _row_reciprocal(x):
    """1/x for a (rows, 1) tensor: EUP approx seed + one Newton step."""
    inv = pl.reciprocal(x, approx=True)
    return inv * (2.0 - x * inv)


def _attention_pass(qx, qy, kx, ky, need_attn):
    """Row-softmax of qx*kx + qy*ky against all keys.

    qx, qy: (tq, 1) query phase components (beta already folded in).
    kx, ky: (1, N)  key phase components (token-on-lane).
    Returns (attn or None, ctx_x, ctx_y); ctx is normalized, shape (tq, 1).
    """
    scores = qx * kx + qy * ky                                # (tq, N)  VPU
    m = jnp.max(scores, axis=-1, keepdims=True)               # (tq, 1)  XLU
    e = jnp.exp(scores - m)                                   # (tq, N)  EUP
    rowsum = jnp.sum(e, axis=-1, keepdims=True)               # (tq, 1)
    inv = _row_reciprocal(rowsum)                             # (tq, 1)
    ctx_x = jnp.sum(e * kx, axis=-1, keepdims=True) * inv     # (tq, 1)
    ctx_y = jnp.sum(e * ky, axis=-1, keepdims=True) * inv     # (tq, 1)
    attn = e * inv if need_attn else None                     # fused normalize
    return attn, ctx_x, ctx_y


# ---------------- Phase A: first attention pass ----------------
def _first_pass_kernel(q_ref, kv_ref, attn_ref, mid_ref, *, dt, beta):
    q = q_ref[0].astype(jnp.float32)        # (2, tq)  query tile, token-on-lane
    kv = kv_ref[0].astype(jnp.float32)      # (2, N)   all states (keys)

    qT = q.T                                # (tq, 2)  small XLU transpose
    # beta folded into the (tq,1) query columns (not the (tq,N) score matrix).
    qx, qy = qT[:, 0:1] * beta, qT[:, 1:2] * beta
    kx, ky = kv[0:1, :], kv[1:2, :]

    attn, cx, cy = _attention_pass(qx, qy, kx, ky, need_attn=True)
    attn_ref[0] = attn.astype(attn_ref.dtype)                 # lane-dense (tq,N)

    ctx = jnp.concatenate([cx, cy], axis=-1)                  # (tq, 2)
    # mid_states = states + dt*context, emitted directly in key layout (2, tq).
    mid_ref[0] = (q + dt * ctx.T).astype(mid_ref.dtype)


# -------- Phase B: mid-point attention pass + Heun-Euler combine --------
def _second_pass_kernel(mq_ref, mkv_ref, sq_ref, evolved_ref, pd_ref, *,
                        dt, beta, epsilon):
    mid = mq_ref[0].astype(jnp.float32)     # (2, tq)  mid-state query tile
    mkv = mkv_ref[0].astype(jnp.float32)    # (2, N)   all mid states (keys)
    s = sq_ref[0].astype(jnp.float32)       # (2, tq)  original states

    mT = mid.T                              # (tq, 2)
    qx, qy = mT[:, 0:1] * beta, mT[:, 1:2] * beta
    kx, ky = mkv[0:1, :], mkv[1:2, :]
    # No attention matrix materialized / normalized on the mid pass.
    _, cx, cy = _attention_pass(qx, qy, kx, ky, need_attn=False)

    k2 = dt * jnp.concatenate([cx, cy], axis=-1).T            # (2, tq)
    k1 = mid - s                    # reconstructed: no HBM round-trip for k1
    half = 0.5 * (k1 + k2)
    evolved = s + half
    # states - evolved == -half  ->  phase distance straight from `half`.
    pd = jnp.sqrt(half[0:1, :] ** 2 + half[1:2, :] ** 2 + epsilon)   # (1, tq)

    evolved_ref[0] = evolved.astype(evolved_ref.dtype)        # lane-dense
    pd_ref[0] = pd.astype(pd_ref.dtype)                       # lane-dense


# ---------- Phase C: superposition skip blend (global max via SMEM scalar) ----------
def _blend_kernel(inv_ref, sq_ref, evolved_ref, pd_ref, out_ref):
    inv = inv_ref[0, 0]                          # 1/(max_distance + eps), SMEM
    s = sq_ref[0].astype(jnp.float32)            # (2, tq)
    evolved = evolved_ref[0].astype(jnp.float32) # (2, tq)
    pd = pd_ref[0].astype(jnp.float32)           # (1, tq)
    w = 1.0 - pd * inv                           # broadcasts over the 2 sublanes
    # w*s + (1-w)*evolved == evolved + w*(s - evolved)
    out_ref[0] = (evolved + w * (s - evolved)).astype(out_ref.dtype)


# ---------------- tiling / VMEM planning ----------------
def _vmem_capacity_bytes():
    try:
        return int(pltpu.get_tpu_info().vmem_capacity_bytes)
    except Exception:
        return 64 << 20      # conservative default: v7x per-core VMEM


def _pick_query_tile(n, b, budget_bytes, max_query_tile=None):
    """Largest query tile whose ~20*tq*N-byte working set fits the budget.

    Valid tiles are N itself or multiple-of-128 divisors of N, so every
    token-on-lane (1, 2, tq) / (1, 1, tq) block stays lane-dense.
    """
    cap = n if max_query_tile is None else min(n, max_query_tile)

    def fits(t):
        return 20 * t * n <= budget_bytes

    aligned = [t for t in (2048, 1024, 512, 256, 128)
               if t < n and n % t == 0 and t <= cap]
    # Prefer full residency unless it busts the budget or would leave a v7x
    # TensorCore idle (B == 1 with a splittable query axis).
    if n <= cap and fits(n) and not (b == 1 and aligned and n >= 256):
        return n
    for t in aligned:                 # largest lane-aligned tile that fits
        if fits(t):
            return t
    if aligned:                       # nothing fits the budget: least-VMEM tile
        return aligned[-1]
    # TODO(synk): for very large N with no multiple-of-128 divisor, add an
    # inner online-softmax loop over keys instead of full query residency.
    return n


def state_evolution_pallas(states, config: QFNNConfig, *,
                           max_query_tile=None,
                           attention_dtype=jnp.float32):
    """states: [B, N, 2] float32 -> (new_states [B, N, 2], attention [B, N, N]).

    attention_dtype=jnp.bfloat16 halves the dominant HBM writeback (useful on
    v5e) when the attention consumer tolerates it; default keeps f32.
    """
    B, N, D = states.shape
    assert D == 2, "quantum phase-space states are 2-D"
    dt = float(config.dt_scale)
    beta = float(config.beta)
    eps = float(config.epsilon)

    vmem_cap = _vmem_capacity_bytes()
    tq = _pick_query_tile(N, B, int(vmem_cap * 0.6), max_query_tile)
    assert N % tq == 0
    grid = (B, N // tq)

    # Single token-on-lane copy of the states; used both as query tiles and keys.
    s_dn = jnp.transpose(states.astype(jnp.float32), (0, 2, 1))     # (B, 2, N)

    q_spec = pl.BlockSpec((1, 2, tq), lambda b, i: (b, 0, i))       # lane-dense
    kv_spec = pl.BlockSpec((1, 2, N), lambda b, i: (b, 0, 0))       # resident per b
    attn_spec = pl.BlockSpec((1, tq, N), lambda b, i: (b, i, 0))    # lane-dense
    pd_spec = pl.BlockSpec((1, 1, tq), lambda b, i: (b, 0, i))      # lane-dense

    cparams = pltpu.CompilerParams(
        dimension_semantics=("parallel", "parallel"),
        # Cover the ~20*tq*N working set with headroom, stay below physical VMEM.
        vmem_limit_bytes=min(int(vmem_cap * 0.9),
                             max(32 << 20, 20 * tq * N + (4 << 20))),
    )
    # Phase A: dominant bytes are the B*N^2 attention writeback.
    cost_a = pl.CostEstimate(flops=10 * B * N * N, transcendentals=B * N * N,
                             bytes_accessed=4 * (B * N * N + 6 * B * N))
    # Phase B: same compute, no N^2 writeback.
    cost_b = pl.CostEstimate(flops=12 * B * N * N, transcendentals=B * N * N,
                             bytes_accessed=4 * 9 * B * N)

    # ---- Phase A: first attention pass -> attention, mid_states (key layout) ----
    attention, mid_dn = pl.pallas_call(
        functools.partial(_first_pass_kernel, dt=dt, beta=beta),
        grid=grid,
        in_specs=[q_spec, kv_spec],
        out_specs=(attn_spec, q_spec),
        out_shape=(
            jax.ShapeDtypeStruct((B, N, N), attention_dtype),
            jax.ShapeDtypeStruct((B, 2, N), jnp.float32),
        ),
        compiler_params=cparams,
        cost_estimate=cost_a,
    )(s_dn, s_dn)

    # ---- Phase B: mid attention pass -> evolved_states, phase_distance ----
    evolved_dn, phase_dist = pl.pallas_call(
        functools.partial(_second_pass_kernel, dt=dt, beta=beta, epsilon=eps),
        grid=grid,
        in_specs=[q_spec, kv_spec, q_spec],
        out_specs=(q_spec, pd_spec),
        out_shape=(
            jax.ShapeDtypeStruct((B, 2, N), jnp.float32),
            jax.ShapeDtypeStruct((B, 1, N), jnp.float32),
        ),
        compiler_params=cparams,
        cost_estimate=cost_b,
    )(mid_dn, mid_dn, s_dn)

    # Global max couples every tile and every batch: one tiny O(B*N) reduce
    # between the calls, passed into Phase C as a single SMEM scalar.
    inv_max = (1.0 / (jnp.max(phase_dist) + eps)).reshape(1, 1).astype(jnp.float32)

    # ---- Phase C: skip blend ----
    new_dn = pl.pallas_call(
        _blend_kernel,
        grid=grid,
        in_specs=[pl.BlockSpec(memory_space=pltpu.MemorySpace.SMEM),
                  q_spec, q_spec, pd_spec],
        out_specs=q_spec,
        out_shape=jax.ShapeDtypeStruct((B, 2, N), jnp.float32),
        compiler_params=cparams,
    )(inv_max, s_dn, evolved_dn, phase_dist)

    # Single tiny layout transpose back to the module's (B, N, 2) convention.
    new_states = jnp.transpose(new_dn, (0, 2, 1))
    return new_states, attention


def state_evolution_ref(states, config: QFNNConfig):
    """Pure-JAX reference mirroring the PyTorch module (for verification)."""
    beta, dt, eps = config.beta, config.dt_scale, config.epsilon
    hi = jax.lax.Precision.HIGHEST

    def attn_fn(s):
        scores = beta * jnp.einsum("bnd,bmd->bnm", s, s, precision=hi)
        attn = jax.nn.softmax(scores, axis=-1)
        ctx = jnp.einsum("bnm,bmd->bnd", attn, s, precision=hi)
        return attn, ctx

    attention, context = attn_fn(states)
    k1 = dt * context
    mid_states = states + k1
    _, mid_context = attn_fn(mid_states)
    k2 = dt * mid_context
    evolved = states + 0.5 * (k1 + k2)
    pd = jnp.sqrt(jnp.sum((states - evolved) ** 2, axis=-1, keepdims=True) + eps)
    md = jnp.max(pd)
    w = 1.0 - pd / (md + eps)
    new_states = w * states + (1.0 - w) * evolved
    return new_states, attention


if __name__ == "__main__":
    config = QFNNConfig(dt_scale=0.1, beta=1.0, epsilon=1e-6)

    def make_states(key, b, n):
        # Quantum phase-space states: unit-circle (cos, sin) pairs.
        theta = jax.random.uniform(key, (b, n), minval=0.0, maxval=2.0 * jnp.pi)
        return jnp.stack([jnp.cos(theta), jnp.sin(theta)], axis=-1).astype(jnp.float32)

    key = jax.random.PRNGKey(0)
    k_small, k_big = jax.random.split(key)

    # Small shape matching the module's toy usage (full query residency, tq = N).
    B, N, D = 2, 8, 2
    states = make_states(k_small, B, N)
    new_states, attention = state_evolution_pallas(states, config)
    jax.block_until_ready((new_states, attention))

    ref_states, ref_attn = state_evolution_ref(states, config)
    assert new_states.shape == (B, N, D) and attention.shape == (B, N, N)
    # 1e-4 tolerance: margin for the EUP approx-reciprocal (+1 Newton step).
    assert jnp.allclose(new_states, ref_states, atol=1e-4, rtol=1e-4)
    assert jnp.allclose(attention, ref_attn, atol=1e-4, rtol=1e-4)

    # Larger shape forcing multiple lane-aligned query tiles (grid (2, 2)) to
    # exercise the tiled path, the key-layout mid states and the SMEM-scalar blend.
    B2, N2 = 2, 256
    states2 = make_states(k_big, B2, N2)
    new_states2, attention2 = state_evolution_pallas(states2, config, max_query_tile=128)
    jax.block_until_ready((new_states2, attention2))
    ref_states2, ref_attn2 = state_evolution_ref(states2, config)
    assert jnp.allclose(new_states2, ref_states2, atol=1e-4, rtol=1e-4)
    assert jnp.allclose(attention2, ref_attn2, atol=1e-4, rtol=1e-4)

    print("KERNEL_OK")
</pallas_src>

<mosaic_0001>
module attributes {stable_mosaic.version = 11 : i64} {
  func.func @_first_pass_kernel(%arg0: i32, %arg1: i32, %arg2: memref<1x2x8xf32, #tpu.memory_space<vmem>>, %arg3: memref<1x2x8xf32, #tpu.memory_space<vmem>>, %arg4: memref<1x8x8xf32, #tpu.memory_space<vmem>>, %arg5: memref<1x2x8xf32, #tpu.memory_space<vmem>>) attributes {dimension_semantics = [#tpu.dimension_semantics<parallel>, #tpu.dimension_semantics<parallel>], iteration_bounds = array<i64: 2, 1>, scalar_prefetch = 0 : i64, scratch_operands = 0 : i64, tpu.core_type = #tpu.core_type<tc>, window_params = [{transform_indices = @transform_0, window_bounds = array<i64: 1, 2, 8>}, {transform_indices = @transform_1, window_bounds = array<i64: 1, 2, 8>}, {transform_indices = @transform_2, window_bounds = array<i64: 1, 8, 8>}, {transform_indices = @transform_3, window_bounds = array<i64: 1, 2, 8>}]} {
    %c0 = arith.constant 0 : index
    %c0_0 = arith.constant 0 : index
    %c0_1 = arith.constant 0 : index
    %0 = vector.load %arg2[%c0, %c0_0, %c0_1] : memref<1x2x8xf32, #tpu.memory_space<vmem>>, vector<1x2x8xf32>
    %1 = vector.shape_cast %0 : vector<1x2x8xf32> to vector<2x8xf32>
    %c0_2 = arith.constant 0 : index
    %c0_3 = arith.constant 0 : index
    %c0_4 = arith.constant 0 : index
    %2 = vector.load %arg3[%c0_2, %c0_3, %c0_4] : memref<1x2x8xf32, #tpu.memory_space<vmem>>, vector<1x2x8xf32>
    %3 = vector.shape_cast %2 : vector<1x2x8xf32> to vector<2x8xf32>
    %4 = tpu.transpose %1, [1, 0] : vector<2x8xf32> -> vector<8x2xf32>
    %5 = vector.extract_strided_slice %4 {offsets = [0, 0], sizes = [8, 1], strides = [1, 1]} : vector<8x2xf32> to vector<8x1xf32>
    %cst = arith.constant 1.000000e+00 : f32
    %6 = vector.broadcast %cst : f32 to vector<8x1xf32>
    %7 = arith.mulf %5, %6 : vector<8x1xf32>
    %8 = vector.extract_strided_slice %4 {offsets = [0, 1], sizes = [8, 1], strides = [1, 1]} : vector<8x2xf32> to vector<8x1xf32>
    %cst_5 = arith.constant 1.000000e+00 : f32
    %9 = vector.broadcast %cst_5 : f32 to vector<8x1xf32>
    %10 = arith.mulf %8, %9 : vector<8x1xf32>
    %11 = vector.extract_strided_slice %3 {offsets = [0, 0], sizes = [1, 8], strides = [1, 1]} : vector<2x8xf32> to vector<1x8xf32>
    %12 = vector.extract_strided_slice %3 {offsets = [1, 0], sizes = [1, 8], strides = [1, 1]} : vector<2x8xf32> to vector<1x8xf32>
    %13 = vector.broadcast %7 : vector<8x1xf32> to vector<8x8xf32>
    %14 = vector.broadcast %11 : vector<1x8xf32> to vector<8x8xf32>
    %15 = arith.mulf %13, %14 : vector<8x8xf32>
    %16 = vector.broadcast %10 : vector<8x1xf32> to vector<8x8xf32>
    %17 = vector.broadcast %12 : vector<1x8xf32> to vector<8x8xf32>
    %18 = arith.mulf %16, %17 : vector<8x8xf32>
    %19 = arith.addf %15, %18 : vector<8x8xf32>
    %cst_6 = arith.constant dense<0xFF800000> : vector<8xf32>
    %20 = vector.multi_reduction <maximumf>, %19, %cst_6 [1] : vector<8x8xf32> to vector<8xf32>
    %21 = vector.shape_cast %20 : vector<8xf32> to vector<8x1xf32>
    %22 = vector.broadcast %21 : vector<8x1xf32> to vector<8x8xf32>
    %23 = arith.subf %19, %22 : vector<8x8xf32>
    %24 = math.exp %23 : vector<8x8xf32>
    %cst_7 = arith.constant dense<0.000000e+00> : vector<8xf32>
    %25 = vector.multi_reduction <add>, %24, %cst_7 [1] : vector<8x8xf32> to vector<8xf32>
    %26 = vector.shape_cast %25 : vector<8xf32> to vector<8x1xf32>
    %27 = tpu.reciprocal %26 {approx = true} : vector<8x1xf32> -> vector<8x1xf32>
    %28 = arith.mulf %26, %27 : vector<8x1xf32>
    %cst_8 = arith.constant 2.000000e+00 : f32
    %29 = vector.broadcast %cst_8 : f32 to vector<8x1xf32>
    %30 = arith.subf %29, %28 : vector<8x1xf32>
    %31 = arith.mulf %27, %30 : vector<8x1xf32>
    %32 = vector.broadcast %11 : vector<1x8xf32> to vector<8x8xf32>
    %33 = arith.mulf %24, %32 : vector<8x8xf32>
    %cst_9 = arith.constant dense<0.000000e+00> : vector<8xf32>
    %34 = vector.multi_reduction <add>, %33, %cst_9 [1] : vector<8x8xf32> to vector<8xf32>
    %35 = vector.shape_cast %34 : vector<8xf32> to vector<8x1xf32>
    %36 = arith.mulf %35, %31 : vector<8x1xf32>
    %37 = vector.broadcast %12 : vector<1x8xf32> to vector<8x8xf32>
    %38 = arith.mulf %24, %37 : vector<8x8xf32>
    %cst_10 = arith.constant dense<0.000000e+00> : vector<8xf32>
    %39 = vector.multi_reduction <add>, %38, %cst_10 [1] : vector<8x8xf32> to vector<8xf32>
    %40 = vector.shape_cast %39 : vector<8xf32> to vector<8x1xf32>
    %41 = arith.mulf %40, %31 : vector<8x1xf32>
    %42 = vector.broadcast %31 : vector<8x1xf32> to vector<8x8xf32>
    %43 = arith.mulf %24, %42 : vector<8x8xf32>
    %c0_11 = arith.constant 0 : index
    %c0_12 = arith.constant 0 : index
    %c0_13 = arith.constant 0 : index
    %44 = vector.load %arg4[%c0_11, %c0_12, %c0_13] : memref<1x8x8xf32, #tpu.memory_space<vmem>>, vector<1x8x8xf32>
    %45 = vector.shape_cast %44 : vector<1x8x8xf32> to vector<8x8xf32>
    %46 = vector.shape_cast %43 : vector<8x8xf32> to vector<1x8x8xf32>
    tpu.vector_store %arg4[%c0_11, %c0_12, %c0_13], %46 {strides = array<i32>} : memref<1x8x8xf32, #tpu.memory_space<vmem>>, vector<1x8x8xf32>,
    %47 = tpu.concatenate %36, %41 in 1 : vector<8x1xf32>, vector<8x1xf32> -> vector<8x2xf32>
    %48 = tpu.transpose %47, [1, 0] : vector<8x2xf32> -> vector<2x8xf32>
    %cst_14 = arith.constant 1.000000e-01 : f32
    %49 = vector.broadcast %cst_14 : f32 to vector<2x8xf32>
    %50 = arith.mulf %49, %48 : vector<2x8xf32>
    %51 = arith.addf %1, %50 : vector<2x8xf32>
    %c0_15 = arith.constant 0 : index
    %c0_16 = arith.constant 0 : index
    %c0_17 = arith.constant 0 : index
    %52 = vector.load %arg5[%c0_15, %c0_16, %c0_17] : memref<1x2x8xf32, #tpu.memory_space<vmem>>, vector<1x2x8xf32>
    %53 = vector.shape_cast %52 : vector<1x2x8xf32> to vector<2x8xf32>
    %54 = vector.shape_cast %51 : vector<2x8xf32> to vector<1x2x8xf32>
    tpu.vector_store %arg5[%c0_15, %c0_16, %c0_17], %54 {strides = array<i32>} : memref<1x2x8xf32, #tpu.memory_space<vmem>>, vector<1x2x8xf32>,
    return
  }
  func.func @transform_0(%arg0: i32, %arg1: i32) -> (i32, i32, i32) {
    %c0_i32 = arith.constant 0 : i32
    %c0_i32_0 = arith.constant 0 : i32
    return %arg0, %c0_i32, %arg1 : i32, i32, i32
  }
  func.func @transform_1(%arg0: i32, %arg1: i32) -> (i32, i32, i32) {
    %c0_i32 = arith.constant 0 : i32
    %c0_i32_0 = arith.constant 0 : i32
    %c0_i32_1 = arith.constant 0 : i32
    return %arg0, %c0_i32, %c0_i32_0 : i32, i32, i32
  }
  func.func @transform_2(%arg0: i32, %arg1: i32) -> (i32, i32, i32) {
    %c0_i32 = arith.constant 0 : i32
    %c0_i32_0 = arith.constant 0 : i32
    return %arg0, %arg1, %c0_i32 : i32, i32, i32
  }
  func.func @transform_3(%arg0: i32, %arg1: i32) -> (i32, i32, i32) {
    %c0_i32 = arith.constant 0 : i32
    %c0_i32_0 = arith.constant 0 : i32
    return %arg0, %c0_i32, %arg1 : i32, i32, i32
  }
}

</mosaic_0001>

<bundles_post_ra>
// kernel: tpu_custom_call.1
= control target key start
LH: loop header
LB: loop body
LE: loop exit
PB: predicated region body
PF: predicated region fallthrough
CT: control target
= control target key end

     0   :  { %9 = vsyncpa [#allocation3], 0  ;;  %s1004_s0 = inlined_call_operand.hbm [shape: f32[2,2,8], index: 0, kind: input, shape index: {}]   ;;  %s1005_s1 = inlined_call_operand.hbm [shape: f32[2,2,8], index: 1, kind: input, shape index: {}]   ;;  %s1006_s2 = inlined_call_operand.hbm [shape: f32[2,8,8], index: 2, kind: output, shape index: {0}]   ;;  %s1007_s3 = inlined_call_operand.hbm [shape: f32[2,2,8], index: 3, kind: output, shape index: {1}]  }
   0x1   :  { %11 = vsyncpa [#allocation3 + $0x1], 0 }
   0x2   :  { %12 = vsyncpa [#allocation6], 0 }
   0x3   :  { %14 = vsyncpa [#allocation6 + $0x1], 0 }
   0x4   :  { %15 = vsyncpa [#allocation4], 0 }
   0x5   :  { %17 = vsyncpa [#allocation4 + $0x1], 0 }
   0x6   :  { %18 = vsyncpa [#allocation9], 0 }
   0x7   :  { %20 = vsyncpa [#allocation9 + $0x1], 0  ;;  %s846_s12 = smov 0   ;;  %s848_s13 = smov 0  }
   0x8   :  { %s850_s14 = smov 0   ;;  %s852_s15 = smov 0  }
   0x9   :  { %s854_s16 = smov 0   ;;  %s856_s17 = smov 0  }
   0xa LB: > { %s543_s18 = sadd.s32 4294967295, %s822_s17   ;;  %s544_s19 = sadd.s32 4294967294, %s822_s17   ;;  %s822_s17 = sphi %s856_s17, %s26_s17   ;;  %s818_s16 = sphi %s854_s16, %s1016_s16   ;;  %s814_s15 = sphi %s852_s15, %s1015_s15   ;;  %s810_s14 = sphi %s850_s14, %s1014_s14   ;;  %s806_s13 = sphi %s848_s13, %s1013_s13   ;;  %s802_s12 = sphi %s846_s12, %s1012_s12  }
   0xb   : > { %s38_s20 = sadd.s32 1, %s818_s16  ;;  %s47_s21 = sadd.s32 1, %s810_s14 }
   0xc   : > { %p40_p0 = scmp.ge.s32.totalorder %s38_s20, 2  ;;  %p54_p1 = scmp.ne.s32.totalorder %s810_s14, %s806_s13 }
   0xd   : > { %p55_p2 = scmp.eq.s32.totalorder %s822_s17, 0  ;;  %p60_p3 = scmp.ne.s32.totalorder %s806_s13, %s802_s12 }
   0xe   : > { %s1018_s20 = smov (%p40_p0, %s38_s20), 0  ;;  %p61_p5 = scmp.eq.s32.totalorder %s543_s18, 0 }
   0xf   : > { %p887_p4 = por %p55_p2, %p54_p1  ;;  %s42_s23 = ssub.s32 %s818_s16, %s1018_s20 }
  0x10   : > { %p112_p6 = scmp.eq.s32.totalorder %s543_s18, 1  ;;  %p45_p7 = scmp.eq.s32.totalorder %s42_s23, 0 }
  0x11   : > { %p893_p8 = por %p61_p5, %p60_p3  ;;  %p118_p10 = scmp.eq.s32.totalorder %s544_s19, 1 }
  0x12   : > { %p897_p9 = por %p112_p6, %p54_p1  ;;  %p546_p12 = scmp.ge.s32.totalorder %s822_s17, 2 }
  0x13   : > { %s902_s26 = scalar_select %p45_p7, %s810_s14, %s47_s21  }
  0x14   : > { %p904_p11 = por %p118_p10, %p60_p3  ;;  %p584_p13 = scmp.lt.s32.totalorder %s822_s17, 2 }
  0x15   : > { %s166_s28 = sand.u32 1, %s810_s14   ;;  %s548_s30 = sshll.u32 %s818_s16, 1 }
  0x16   : > { %s547_s29 = sshll.u32 %s166_s28, 1  ;;  %s175_s6 = scalar_lea.hbm %s1004_s0, %s548_s30 }
  0x17   : > { %s170_s7 = scalar_lea.vmem [#allocation2], %s547_s29  ;;  %s177_s9 = sshll.u32 %s175_s6, 4  ;;  %s178_s9 = int_to_ptr.hbm [resolvable:$true] %s177_s9 }
  0x18   : > { %s179_s8 = sshll.u32 %s170_s7, 4  ;;  %p571_p0 = pnand %p584_p13, %p887_p4  ;;  %s180_s8 = int_to_ptr.vmem [resolvable:$true] %s179_s8 }
  0x19   : > { %p551_p1 = scmp.ge.s32.totalorder %s822_s17, 1  ;;  %p203_p2 = scmp.lt.s32.totalorder %s822_s17, 3 }
  0x1a   : > { %s167_s10 = scalar_lea.sflag [#allocation3], %s166_s28  ;;  %s194_s19 = scalar_lea.hbm %s1005_s1, %s548_s30 }
  0x1b   : > { %573 = dma.hbm_to_vmem [thread:$0]  (!%p571_p0), %s178_s9, 32, %s180_s8, %s167_s10  }
  0x1c   : > { %p204_p3 = pnand %p551_p1, %p203_p2  ;;  %s190_s21 = scalar_lea.vmem [#allocation5], %s547_s29 }
  0x1d   : > { %s198_s23 = sshll.u32 %s190_s21, 4  ;;  %s196_s4 = sshll.u32 %s194_s19, 4  ;;  %s199_s23 = int_to_ptr.vmem [resolvable:$true] %s198_s23  ;;  %s197_s4 = int_to_ptr.hbm [resolvable:$true] %s196_s4 }
  0x1e   : > { %s187_s5 = scalar_lea.sflag [#allocation6], %s166_s28  ;;  %207 = sbr.rel (%p204_p3) target bundleno = 748 (0x2ec), region = 28 }
  0x1f   : > { %576 = dma.hbm_to_vmem [thread:$0]  (!%p571_p0), %s197_s4, 32, %s199_s23, %s187_s5  }
  0x20   : > { %s923_s22 = sand.u32 (!%p204_p3), 1, %s806_s13  }
  0x21   : > { %s926_s6 = sshll.u32 (!%p204_p3), %s923_s22, 1  ;;  %s210_s7 = scalar_lea.sflag (!%p204_p3), [#allocation3], %s923_s22 }
  0x22   : > { %s213_s8 = scalar_lea.vmem (!%p204_p3), [#allocation2], %s926_s6 }
  0x23   : > { %785 = dma.done.wait (%p893_p8), %s210_s7, 32  }
  0x24   : > { %787 = vsyncadd (%p893_p8), %s210_s7, 4294967264  ;;  %s220_s28 = scalar_lea.sflag [#allocation6], %s923_s22  ;;  %s223_s29 = scalar_lea.vmem [#allocation5], %s926_s6 }
  0x25   : > { %789 = dma.done.wait (%p893_p8), %s220_s28, 32  }
  0x26   : > { %791 = vsyncadd (%p893_p8), %s220_s28, 4294967264  ;;  %v824_v0 = vmov 1   ;;  %v940_v1 = vld [vmem:[%s213_s8] sm:$0x3]  ;;  %v825_v2 = vmov 0   ;;  %vm305_vm0 = vcmask 64512  }
  0x27   : > { %638 = vset.pattern.permute.xlu1 %v824_v0  ;;  %259 = vxpose.xlu0.b32.start.end [1/1] (short) (narrow) %v940_v1, 8  ;;  %v258_v4 = vld [vmem:[%s223_s29] sm:$0x3]  ;;  %s554_s24 = sshll.u32 %s923_s22, 3  ;;  %vm331_vm1 = vcmask 7168   ;;  %s558_s9 = sshll.u32 %s814_s15, 3 }
  0x28   : > { %v302_v5 = vperm.slane %v258_v4, 1  ;;  %v296_v6 = vperm.slane %v258_v4, 0  ;;  %s249_s30 = scalar_lea.vmem [#allocation7], %s554_s24  ;;  %s386_s18 = scalar_lea.hbm %s1006_s2, %s558_s9 }
  0x29   : > { %s388_s19 = sshll.u32 %s249_s30, 4  ;;  %s390_s21 = sshll.u32 %s386_s18, 4  ;;  %s389_s19 = int_to_ptr.vmem [resolvable:$true] %s388_s19  ;;  %s391_s21 = int_to_ptr.hbm [resolvable:$true] %s390_s21 }
  0x2a   : > { %s370_s23 = scalar_lea.sflag [#allocation4], %s923_s22  ;;  %s718_s4 = sshra.s32 %s391_s21, 4  ;;  %s719_s4 = int_to_ptr.hbm [resolvable:$true] %s718_s4 }
  0x2b   : > { %s720_s5 = scalar_lea.hbm %s719_s4, 8  ;;  %s724_s28 = scalar_lea.hbm %s1006_s2, 16 }
  0x2c   : > { %p721_p4 = scmp.ne.s32.totalorder %s719_s4, %s720_s5  ;;  %p725_p7 = scmp.lt.s32.totalorder %s719_s4, %s1006_s2 }
  0x2d   : > { %p726_p8 = scmp.lt.s32.totalorder %s724_s28, %s720_s5 }
  0x2e   : > { %p722_p5 = pnand %p721_p4, %p897_p9 }
  0x2f   : > { %p727_p10 = por %p726_p8, %p725_p7 }
  0x30   : > { %p723_p6 = pneg %p722_p5 }
  0x32   : > { %p728_p13 = pnand %p727_p10, %p723_p6 }
  0x8e   : > { %637 = vset.pattern.permute.xlu0 %v825_v2 }
  0xcb   : > { %v275_v3 = vpop.trf.xlu0 }
  0xcc   : > { %299 = vperm.xlu1 %638, %v275_v3   ;;  %293 = vperm.xlu0 %637, %v275_v3  }
  0xd4   : > { %639 = vset.pattern.permute.xlu0 %v824_v0 }
 0x13e   : > { %v300_v7 = vpop.permute.xlu1 %299  ;;  %v294_v8 = vpop.permute.xlu0 %293 }
 0x13f   : > { %v303_v9 = vmul.f32 %v302_v5, %v300_v7  ;;  %v297_v10 = vmul.f32 %v296_v6, %v294_v8 }
 0x141   : > { %v304_v11 = vadd.f32 %v303_v9, %v297_v10 }
 0x143   : > { %v306_v12 = vsel %vm305_vm0, %v304_v11, -inf }
 0x144   : > { %307 = vmax.xlane.f32.xlu1 %v306_v12 }
 0x1b7   : > { %v308_v13 = vpop.xlane.xlu1 %307 }
 0x1b8   : > { %v309_v14 = vsub.f32 %v304_v11, %v308_v13 }
 0x1ba   : > { %v310_v15 = vmul.f32 1.442695, %v309_v14 }
 0x1bc   : > { %640 = vpow2.f32 %v310_v15 }
 0x1c2   : > { %v641_v16 = vpop.eup %640 }
 0x1c3   : > { %v312_v17 = vsel %vm305_vm0, %v641_v16, 0.0  ;;  %v319_v18 = vmul.f32 %v641_v16, %v296_v6  ;;  %v324_v20 = vmul.f32 %v641_v16, %v302_v5 }
 0x1c4   : > { %313 = vadd.xlane.f32.xlu2 %v312_v17 }
 0x1c5   : > { %v320_v19 = vsel %vm305_vm0, %v319_v18, 0.0  ;;  %v325_v21 = vsel %vm305_vm0, %v324_v20, 0.0 }
 0x1cc   : > { %321 = vadd.xlane.f32.xlu2 %v320_v19 }
 0x1d4   : > { %326 = vadd.xlane.f32.xlu2 %v325_v21 }
 0x237   : > { %v314_v22 = vpop.xlane.xlu2 %313 }
 0x238   : > { %642 = vrcp.f32 %v314_v22 }
 0x23e   : > { %v643_v23 = vpop.eup %642 }
 0x23f   : > { %v316_v24 = vmul.f32 %v643_v23, %v314_v22  ;;  %v322_v25 = vpop.xlane.xlu2 %321 }
 0x241   : > { %v317_v26 = vsub.f32 2.0, %v316_v24 }
 0x243   : > { %v318_v27 = vmul.f32 %v643_v23, %v317_v26 }
 0x245   : > { %v329_v28 = vmul.f32 %v641_v16, %v318_v27  ;;  %v323_v30 = vmul.f32 %v322_v25, %v318_v27 }
 0x247   : > { %v327_v29 = vpop.xlane.xlu2 %326  ;;  %330 = vst.msk [vmem:[%s249_s30] sm:$0xff] %vm305_vm0, %v329_v28 }
 0x248   : > { %v328_v31 = vmul.f32 %v327_v29, %v318_v27 }
 0x24a   : > { %v332_v32 = vsel %vm331_vm1, %v323_v30, %v328_v31 }
 0x24b   : > { %333 = vxpose.xlu2.b32.start.end [1/1] (short) (narrow) %v332_v32, 8 }
 0x24c   : > { %731 = shalt.err (!%p728_p13)
}
 0x24d   : > { %566 = dma.vmem_to_hbm [thread:$0]  (%p897_p9), %s389_s19, 128, %s391_s21, %s370_s23   ;;  %vm367_vm2 = vcmask 58368  }
 0x24e   : > { %s559_s30 = sshll.u32 %s814_s15, 1  ;;  %s256_s18 = scalar_lea.vmem [#allocation8], %s926_s6 }
 0x24f   : > { %s401_s11 = scalar_lea.hbm %s1007_s3, %s559_s30  ;;  %s403_s7 = sshll.u32 %s256_s18, 4  ;;  %s404_s7 = int_to_ptr.vmem [resolvable:$true] %s403_s7 }
 0x250   : > { %s405_s4 = sshll.u32 %s401_s11, 4  ;;  %s375_s5 = scalar_lea.sflag [#allocation9], %s923_s22  ;;  %s406_s4 = int_to_ptr.hbm [resolvable:$true] %s405_s4 }
 0x251   : > { %s746_s8 = sshra.s32 %s406_s4, 4  ;;  %s752_s6 = scalar_lea.hbm %s1007_s3, 4  ;;  %s747_s8 = int_to_ptr.hbm [resolvable:$true] %s746_s8 }
 0x252   : > { %s748_s15 = scalar_lea.hbm %s747_s8, 2  ;;  %p753_p3 = scmp.lt.s32.totalorder %s747_s8, %s1007_s3 }
 0x253   : > { %p749_p0 = scmp.ne.s32.totalorder %s747_s8, %s748_s15  ;;  %p754_p4 = scmp.lt.s32.totalorder %s752_s6, %s748_s15 }
 0x255   : > { %p750_p1 = pnand %p749_p0, %p897_p9  ;;  %p755_p5 = por %p754_p4, %p753_p3 }
 0x257   : > { %p751_p2 = pneg %p750_p1 }
 0x259   : > { %p756_p6 = pnand %p755_p5, %p751_p2 }
 0x2e4   : > { %v349_v33 = vpop.trf.xlu2 }
 0x2e5   : > { %v365_v34 = vmul.f32 0.1, %v349_v33 }
 0x2e7   : > { %v366_v35 = vadd.f32 %v365_v34, %v940_v1 }
 0x2e9   : > { %368 = vst.msk [vmem:[%s256_s18] sm:$0x3] %vm367_vm2, %v366_v35 }
 0x2ea   : > { %759 = shalt.err (!%p756_p6)
}
 0x2eb   : > { %567 = dma.vmem_to_hbm [thread:$0]  (%p897_p9), %s404_s7, 32, %s406_s4, %s375_s5  }
 0x2ec PF: > { %s417_s22 = sand.u32 1, %s802_s12   ;;  %p578_p7 = pnand %p546_p12, %p904_p11 }
 0x2ed   : > { %s418_s29 = scalar_lea.sflag [#allocation4], %s417_s22 }
 0x2ee   : > { %p579_p8 = pneg %p578_p7 }
 0x2f0   : > { %793 = dma.done.wait (%p579_p8), %s418_s29, 128  }
 0x2f1   : > { %795 = vsyncadd (%p579_p8), %s418_s29, 4294967168  ;;  %s428_s24 = scalar_lea.sflag [#allocation9], %s417_s22 }
 0x2f2   : > { %797 = dma.done.wait (%p579_p8), %s428_s24, 32  }
 0x2f3   : > { %799 = vsyncadd (%p579_p8), %s428_s24, 4294967264  ;;  %s26_s17 = sadd.s32 1, %s822_s17   ;;  %s1012_s12 = smov %s806_s13 }
 0x2f4   : > { %p23_p10 = scmp.ge.s32.totalorder %s26_s17, 4   ;;  %s1013_s13 = smov %s810_s14 }
 0x2f5   : > { %s1014_s14 = smov %s902_s26  ;;  %s1015_s15 = smov %s818_s16 }
 0x2f6   : > { %s1016_s16 = smov %s1018_s20  ;;  %25 = sbr.rel (!%p23_p10) target bundleno = 10 (0xa), region = 103 }
 0x2fb   :  { %434 = vsyncpa [#allocation3], 1 }
 0x2fc   :  { %436 = vsyncpa [#allocation3 + $0x1], 1 }
 0x2fd   :  { %437 = vsyncpa [#allocation6], 1 }
 0x2fe   :  { %439 = vsyncpa [#allocation6 + $0x1], 1 }
 0x2ff   :  { %440 = vsyncpa [#allocation4], 1 }
 0x300   :  { %442 = vsyncpa [#allocation4 + $0x1], 1 }
 0x301   :  { %443 = vsyncpa [#allocation9], 1 }
 0x302   :  { %445 = vsyncpa [#allocation9 + $0x1], 1 }

</bundles_post_ra>
